<compile_context>
chip_gen: v7x
topology: tpu7x:2x2x1
jax: 0.10.0
libtpu: 0.0.40
codegen_flags: <defaults>
</compile_context>

<pallas_src>
import math
import functools

import jax
import jax.numpy as jnp
from jax.experimental import pallas as pl
from jax.experimental.pallas import tpu as pltpu


# ---------------------------------------------------------------------------
# Kernel
# ---------------------------------------------------------------------------
def _arcface_kernel(labels_ref, logits_ref, out_ref, *,
                    scale, cos_m, sin_m, theta, sinmm, tile_c, col_grid):
    # labels_ref: (TN, 1) int32 (sanitized: never negative, out-of-range means
    #             "ignore"), logits_ref/out_ref: (TN, TC)
    lbl = labels_ref[...]                               # (TN, 1)
    x = logits_ref[...].astype(jnp.float32)             # (TN, TC)

    if col_grid:
        # Apply the column offset to the (TN,1) label instead of adding it to
        # the full (TN,TC) iota: one fewer full-tile VALU op per column tile.
        lbl = lbl - pl.program_id(1) * tile_c
    col = jax.lax.broadcasted_iota(jnp.int32, x.shape, 1)

    # Labels were sanitized in the wrapper, so a plain compare suffices
    # (ignored rows carry a value that never matches any column).
    is_target = col == lbl

    t = x
    sin_theta = jnp.sqrt(1.0 - t * t)                   # unclamped, matches spec
    cos_theta_m = t * cos_m - sin_theta * sin_m
    # easy_margin = False branch
    final_target = jnp.where(t > theta, cos_theta_m, t - sinmm)

    out_ref[...] = (jnp.where(is_target, final_target, x) * scale).astype(out_ref.dtype)


# ---------------------------------------------------------------------------
# Tiling helpers
# ---------------------------------------------------------------------------
def _round_up(x, m):
    return ((x + m - 1) // m) * m


def _pick_tile(dim, max_tile, unit):
    """Largest tile <= max_tile that evenly tiles `dim` (dim is a multiple of unit)."""
    if dim <= max_tile:
        return dim
    t = (max_tile // unit) * unit
    while t >= unit:
        if dim % t == 0:
            return t
        t -= unit
    return unit


def _vmem_capacity_bytes():
    try:
        return int(pltpu.get_tpu_info().vmem_capacity_bytes)
    except Exception:
        return 64 << 20  # conservative (v7x-sized) fallback


# ---------------------------------------------------------------------------
# Wrapper
# ---------------------------------------------------------------------------
def arcface_forward(logits, labels, *, s=64.0, margin=0.5, tile_budget_bytes=None):
    """ArcFace forward.

    logits: (N, C) float32/bfloat16 cosine logits; labels: (N,) int (-1 = ignore).

    NOTE: the pallas_call aliases the logits buffer to the output. For the
    in-place rewrite to actually avoid a defensive HBM copy, donate the logits
    argument at your jit boundary, e.g.
        jax.jit(arcface_forward, donate_argnums=(0,))
    """
    if margin == 0.0:
        # Fast path (not aliased / in-place, matching the PyTorch early return).
        return logits * s

    N, C = logits.shape
    itemsize = jnp.dtype(logits.dtype).itemsize

    # ---- pad to (8, 128) alignment if necessary --------------------------------
    N_pad = _round_up(N, 8)
    C_pad = _round_up(C, 128)
    x = logits
    lbl = labels.astype(jnp.int32)
    if (N_pad - N) or (C_pad - C):
        x = jnp.pad(x, ((0, N_pad - N), (0, C_pad - C)))
    if N_pad - N:
        lbl = jnp.pad(lbl, (0, N_pad - N), constant_values=-1)
    # Sanitize: ignored rows point at a column index that never exists, so the
    # kernel mask is a single compare. Padded columns (< C_pad) never match a
    # real label (< C) either.
    lbl = jnp.where(lbl < 0, jnp.int32(C_pad), lbl).reshape(N_pad, 1)

    # ---- per-chip tile budget ---------------------------------------------------
    vmem_cap = _vmem_capacity_bytes()
    small_vmem = vmem_cap < (100 << 20)           # v7x-like: 64 MiB / TC, 2 TCs
    if tile_budget_bytes is None:
        tile_budget_bytes = (4 << 20) if small_vmem else (8 << 20)

    # Grow tile_c toward full C first (contiguous DMAs, lane-dense stores),
    # then size tile_n from the remaining budget.
    max_tile_c = max(128, tile_budget_bytes // (itemsize * 8))
    tile_c = _pick_tile(C_pad, max_tile_c, 128)
    max_tile_n = max(8, (tile_budget_bytes // (itemsize * tile_c)) // 8 * 8)
    tile_n = _pick_tile(N_pad, max_tile_n, 8)

    # On 2-TC / small-VMEM parts, make sure there are enough grid steps so both
    # cores get work and the DMA pipeline reaches steady state.
    if small_vmem:
        col_steps = C_pad // tile_c
        min_steps, min_tile_bytes = 8, (1 << 20)
        while (N_pad // tile_n) * col_steps < min_steps and tile_n > 8:
            cand = tile_n - 8
            while cand >= 8 and N_pad % cand != 0:
                cand -= 8
            if cand < 8 or cand * tile_c * itemsize < min_tile_bytes:
                break
            tile_n = cand

    col_grid = tile_c < C_pad

    cos_m = math.cos(margin)
    sin_m = math.sin(margin)
    theta = math.cos(math.pi - margin)
    sinmm = math.sin(math.pi - margin) * margin

    kernel = functools.partial(
        _arcface_kernel,
        scale=s, cos_m=cos_m, sin_m=sin_m, theta=theta, sinmm=sinmm,
        tile_c=tile_c, col_grid=col_grid,
    )

    if col_grid:
        # Column axis is the inner grid axis; the labels block index is constant
        # across it, so the labels tile stays resident per row-tile.
        grid = (N_pad // tile_n, C_pad // tile_c)
        lbl_spec = pl.BlockSpec((tile_n, 1), lambda i, j: (i, 0))
        x_spec = pl.BlockSpec((tile_n, tile_c), lambda i, j: (i, j))
        dim_sem = ("parallel", "parallel")
    else:
        grid = (N_pad // tile_n,)
        lbl_spec = pl.BlockSpec((tile_n, 1), lambda i: (i, 0))
        x_spec = pl.BlockSpec((tile_n, tile_c), lambda i: (i, 0))
        dim_sem = ("parallel",)

    # VMEM budget: 2x double-buffered input + 2x output tiles, plus the labels
    # block which is lane-padded to (tile_n, 128) int32, plus headroom.
    tile_bytes = tile_n * tile_c * itemsize
    lbl_tile_bytes = tile_n * 128 * 4
    vmem_needed = 4 * tile_bytes + 2 * lbl_tile_bytes + (2 << 20)
    vmem_cap_limit = (40 << 20) if small_vmem else (96 << 20)
    vmem_limit = min(max(vmem_needed, 16 << 20), vmem_cap_limit)

    out = pl.pallas_call(
        kernel,
        out_shape=jax.ShapeDtypeStruct((N_pad, C_pad), logits.dtype),
        grid_spec=pltpu.PrefetchScalarGridSpec(
            num_scalar_prefetch=0,
            grid=grid,
            in_specs=[lbl_spec, x_spec],
            out_specs=x_spec,
        ),
        input_output_aliases={1: 0},  # logits buffer reused for the output
        compiler_params=pltpu.CompilerParams(
            dimension_semantics=dim_sem,
            vmem_limit_bytes=vmem_limit),
    )(lbl, x)

    if (N_pad - N) or (C_pad - C):
        out = out[:N, :C]
    return out


# ---------------------------------------------------------------------------
# Pure-JAX reference (matches the PyTorch forward)
# ---------------------------------------------------------------------------
def arcface_reference(logits, labels, *, s=64.0, margin=0.5):
    if margin == 0.0:
        return logits * s
    cos_m = math.cos(margin)
    sin_m = math.sin(margin)
    theta = math.cos(math.pi - margin)
    sinmm = math.sin(math.pi - margin) * margin

    N, C = logits.shape
    col = jnp.arange(C, dtype=jnp.int32)[None, :]
    lbl = labels.astype(jnp.int32)[:, None]
    is_target = (col == lbl) & (lbl != -1)

    t = logits.astype(jnp.float32)
    sin_theta = jnp.sqrt(1.0 - t * t)
    cos_theta_m = t * cos_m - sin_theta * sin_m
    final = jnp.where(t > theta, cos_theta_m, t - sinmm)
    return (jnp.where(is_target, final, t) * s).astype(logits.dtype)


if __name__ == "__main__":
    key = jax.random.PRNGKey(0)
    k1, k2, k3, k4 = jax.random.split(key, 4)

    # Small shapes consistent with the module: 8 rows (batch), 256 classes.
    N, C = 8, 256
    # ArcFace logits are cosine similarities -> keep them in (-1, 1)
    logits = jax.random.uniform(k1, (N, C), jnp.float32, -0.99, 0.99)
    labels = jax.random.randint(k2, (N,), 0, C, jnp.int32)
    labels = labels.at[1].set(-1).at[5].set(-1)   # some ignored rows

    ref = arcface_reference(logits, labels)

    # Path 1: full-C column tile, 1-D grid, with the logits buffer donated so
    # input_output_aliases actually reuses it (true in-place rewrite).
    f = jax.jit(arcface_forward, donate_argnums=(0,))
    out1 = jax.block_until_ready(f(jnp.array(logits), labels))
    assert jnp.allclose(out1, ref, atol=1e-5, rtol=1e-5), "mismatch (1-D grid path)"

    # Path 2: tiny per-tile budget forces the column-tiled 2-D grid path.
    out2 = jax.block_until_ready(
        arcface_forward(jnp.array(logits), labels, tile_budget_bytes=4096))
    assert jnp.allclose(out2, ref, atol=1e-5, rtol=1e-5), "mismatch (2-D grid path)"

    # Path 3: ragged shapes exercise the pad-to-(8,128) path.
    N3, C3 = 6, 200
    logits3 = jax.random.uniform(k3, (N3, C3), jnp.float32, -0.99, 0.99)
    labels3 = jax.random.randint(k4, (N3,), 0, C3, jnp.int32).at[2].set(-1)
    ref3 = arcface_reference(logits3, labels3)
    out3 = jax.block_until_ready(arcface_forward(logits3, labels3))
    assert out3.shape == (N3, C3)
    assert jnp.allclose(out3, ref3, atol=1e-5, rtol=1e-5), "mismatch (padded path)"

    print("KERNEL_OK")
</pallas_src>

<mosaic_0001>
module attributes {stable_mosaic.version = 11 : i64} {
  func.func @_arcface_kernel(%arg0: i32, %arg1: memref<8x1xi32, #tpu.memory_space<vmem>>, %arg2: memref<8x256xf32, #tpu.memory_space<vmem>>, %arg3: memref<8x256xf32, #tpu.memory_space<vmem>>) attributes {dimension_semantics = [#tpu.dimension_semantics<parallel>], iteration_bounds = array<i64: 1>, scalar_prefetch = 0 : i64, scratch_operands = 0 : i64, tpu.core_type = #tpu.core_type<tc>, window_params = [{transform_indices = @transform_0, window_bounds = array<i64: 8, 1>}, {transform_indices = @transform_1, window_bounds = array<i64: 8, 256>}, {transform_indices = @transform_2, window_bounds = array<i64: 8, 256>}]} {
    %c0 = arith.constant 0 : index
    %c0_0 = arith.constant 0 : index
    %0 = vector.load %arg1[%c0, %c0_0] : memref<8x1xi32, #tpu.memory_space<vmem>>, vector<8x1xi32>
    %c0_1 = arith.constant 0 : index
    %c0_2 = arith.constant 0 : index
    %1 = vector.load %arg2[%c0_1, %c0_2] : memref<8x256xf32, #tpu.memory_space<vmem>>, vector<8x256xf32>
    %2 = tpu.iota {dimensions = array<i32: 1>} : vector<8x256xi32>
    %3 = vector.broadcast %0 : vector<8x1xi32> to vector<8x256xi32>
    %4 = arith.cmpi eq, %2, %3 : vector<8x256xi32>
    %5 = arith.mulf %1, %1 : vector<8x256xf32>
    %cst = arith.constant 1.000000e+00 : f32
    %6 = vector.broadcast %cst : f32 to vector<8x256xf32>
    %7 = arith.subf %6, %5 : vector<8x256xf32>
    %8 = math.sqrt %7 : vector<8x256xf32>
    %cst_3 = arith.constant 0.87758255 : f32
    %9 = vector.broadcast %cst_3 : f32 to vector<8x256xf32>
    %10 = arith.mulf %1, %9 : vector<8x256xf32>
    %cst_4 = arith.constant 0.47942555 : f32
    %11 = vector.broadcast %cst_4 : f32 to vector<8x256xf32>
    %12 = arith.mulf %8, %11 : vector<8x256xf32>
    %13 = arith.subf %10, %12 : vector<8x256xf32>
    %cst_5 = arith.constant -0.87758255 : f32
    %14 = vector.broadcast %cst_5 : f32 to vector<8x256xf32>
    %15 = arith.cmpf ogt, %1, %14 : vector<8x256xf32>
    %cst_6 = arith.constant 0.239712775 : f32
    %16 = vector.broadcast %cst_6 : f32 to vector<8x256xf32>
    %17 = arith.subf %1, %16 : vector<8x256xf32>
    %18 = arith.select %15, %13, %17 : vector<8x256xi1>, vector<8x256xf32>
    %19 = arith.select %4, %18, %1 : vector<8x256xi1>, vector<8x256xf32>
    %cst_7 = arith.constant 6.400000e+01 : f32
    %20 = vector.broadcast %cst_7 : f32 to vector<8x256xf32>
    %21 = arith.mulf %19, %20 : vector<8x256xf32>
    %c0_8 = arith.constant 0 : index
    %c0_9 = arith.constant 0 : index
    %22 = vector.load %arg3[%c0_8, %c0_9] : memref<8x256xf32, #tpu.memory_space<vmem>>, vector<8x256xf32>
    tpu.vector_store %arg3[%c0_8, %c0_9], %21 {strides = array<i32>} : memref<8x256xf32, #tpu.memory_space<vmem>>, vector<8x256xf32>,
    return
  }
  func.func @transform_0(%arg0: i32) -> (i32, i32) {
    %c0_i32 = arith.constant 0 : i32
    %c0_i32_0 = arith.constant 0 : i32
    return %arg0, %c0_i32 : i32, i32
  }
  func.func @transform_1(%arg0: i32) -> (i32, i32) {
    %c0_i32 = arith.constant 0 : i32
    %c0_i32_0 = arith.constant 0 : i32
    return %arg0, %c0_i32 : i32, i32
  }
  func.func @transform_2(%arg0: i32) -> (i32, i32) {
    %c0_i32 = arith.constant 0 : i32
    %c0_i32_0 = arith.constant 0 : i32
    return %arg0, %c0_i32 : i32, i32
  }
}

</mosaic_0001>

<bundles_post_ra>
// kernel: arcface_forward.1
= control target key start
LH: loop header
LB: loop body
LE: loop exit
PB: predicated region body
PF: predicated region fallthrough
CT: control target
= control target key end

     0   :  { %7 = vsyncpa [#allocation3], 0  ;;  %s189_s0 = inlined_call_operand.vmem [shape: s32[8,1], index: 0, kind: input, shape index: {}]   ;;  %s190_s1 = inlined_call_operand.hbm [shape: f32[8,256], index: 1, kind: input, shape index: {}, may-alias: {1,2}]   ;;  %s191_s2 = inlined_call_operand.hbm [shape: f32[8,256], index: 2, kind: output, shape index: {}, may-alias: {1,2}]  }
   0x1   :  { %8 = vsyncpa [#allocation4], 0  ;;  %s144_s9 = smov [#allocation2]   ;;  %s96_s13 = scalar_lea.hbm %s190_s1, 256 }
   0x2   :  { %s17_s10 = sshll.u32 %s144_s9, 4  ;;  %p97_p0 = scmp.ne.s32.totalorder %s190_s1, %s96_s13  ;;  %s18_s10 = int_to_ptr.vmem [resolvable:$true] %s17_s10 }
   0x3   :  { %p100_p1 = scmp.lt.u32.totalorder %s96_s13, %s190_s1 }
   0x5   :  { %p102_p2 = pnand %p100_p1, %p97_p0 }
   0x7   :  { %105 = shalt.err (!%p102_p2)
}
   0x8   :  { %s106_s18 = scalar_lea.vmem %s18_s10, 256  ;;  %p111_p4 = scmp.lt.s32.totalorder %s18_s10, %s18_s10 }
   0x9   :  { %p107_p3 = scmp.ne.s32.totalorder %s18_s10, %s106_s18  ;;  %p112_p5 = scmp.lt.s32.totalorder %s106_s18, %s106_s18 }
   0xb   :  { %p113_p6 = por %p112_p5, %p111_p4 }
   0xd   :  { %p114_p7 = pnand %p113_p6, %p107_p3 }
   0xf   :  { %117 = shalt.err (!%p114_p7)
}
  0x10   :  { %20 = dma.hbm_to_vmem [thread:$0]  %s190_s1, 256, %s18_s10, [#allocation3]  }
  0x11   :  { %140 = dma.done.wait [#allocation3], 256  }
  0x12   :  { %141 = vsyncadd [#allocation3], 4294967040  ;;  %v145_v0 = vmov 0   ;;  %v24_v1 = vld [vmem:[%s189_s0] sm:$0xff]  ;;  %v26_v3 = vld [vmem:[#allocation2 + $0x8] sm:$0xff]  ;;  %v27_v18 = vlaneseq  ;;  %s146_s0 = smov [#allocation5]  }
  0x13   :  { %91 = vset.pattern.permute.xlu0 %v145_v0  ;;  %v25_v2 = vld [vmem:[#allocation2] sm:$0xff]  ;;  %v36_v5 = vmul.f32 %v26_v3, %v26_v3  ;;  %v54_v20 = vmul.f32 0.87758255, %v26_v3  ;;  %v87_v27 = vadd.f32 -0.23971277, %v26_v3  ;;  %s77_s1 = sshll.u32 %s146_s0, 4  ;;  %s78_s1 = int_to_ptr.vmem [resolvable:$true] %s77_s1 }
  0x14   :  { %31 = vperm.xlu0 %91, %v24_v1   ;;  %v35_v4 = vmul.f32 %v25_v2, %v25_v2  ;;  %v53_v19 = vmul.f32 0.87758255, %v25_v2  ;;  %v28_v23 = vand.u32 127, %v27_v18  ;;  %v86_v26 = vadd.f32 -0.23971277, %v25_v2  ;;  %s118_s23 = scalar_lea.vmem %s78_s1, 256  ;;  %p123_p9 = scmp.lt.s32.totalorder %s78_s1, %s78_s1 }
  0x15   :  { %v38_v7 = vsub.f32 1.0, %v36_v5  ;;  %vm59_vm4 = vcmp.gt.f32.partialorder %v25_v2, -0.87758255  ;;  %vm60_vm5 = vcmp.gt.f32.partialorder %v26_v3, -0.87758255  ;;  %p119_p8 = scmp.ne.s32.totalorder %s78_s1, %s118_s23  ;;  %p124_p10 = scmp.lt.s32.totalorder %s118_s23, %s118_s23 }
  0x16   :  { %v37_v6 = vsub.f32 1.0, %v35_v4  ;;  %v29_v28 = vadd.s32 128, %v28_v23 }
  0x17   :  { %vm48_vm1 = vcmp.eq.f32.partialorder %v38_v7, inf  ;;  %v51_v13 = vand.u32 2147483648, %v38_v7  ;;  %vm50_vm3 = vcmp.eq.f32.partialorder %v38_v7, 0.0  ;;  %p125_p11 = por %p124_p10, %p123_p9 }
  0x18   :  { %92 = vrsqrt.f32 %v37_v6  ;;  %vm41_vm0 = vcmp.eq.f32.partialorder %v37_v6, inf  ;;  %v44_v12 = vand.u32 2147483648, %v37_v6  ;;  %vm43_vm2 = vcmp.eq.f32.partialorder %v37_v6, 0.0 }
  0x19   :  { %94 = vrsqrt.f32 %v38_v7  ;;  %p126_p12 = pnand %p125_p11, %p119_p8 }
  0x22   :  { %v93_v8 = vpop.eup %92 }
  0x23   :  { %v95_v9 = vpop.eup %94  ;;  %v40_v10 = vmul.f32 %v93_v8, %v37_v6 }
  0x24   :  { %v47_v11 = vmul.f32 %v95_v9, %v38_v7 }
  0x25   :  { %v42_v14 = vsel %vm41_vm0, %v37_v6, %v40_v10 }
  0x26   :  { %v49_v15 = vsel %vm48_vm1, %v38_v7, %v47_v11  ;;  %v45_v16 = vsel %vm43_vm2, %v44_v12, %v42_v14 }
  0x27   :  { %v52_v17 = vsel %vm50_vm3, %v51_v13, %v49_v15  ;;  %v55_v21 = vmul.f32 0.47942555, %v45_v16 }
  0x28   :  { %v56_v22 = vmul.f32 0.47942555, %v52_v17 }
  0x29   :  { %v57_v24 = vsub.f32 %v53_v19, %v55_v21 }
  0x2a   :  { %v58_v25 = vsub.f32 %v54_v20, %v56_v22 }
  0x2b   :  { %v63_v29 = vsel %vm59_vm4, %v57_v24, %v86_v26 }
  0x2c   :  { %v64_v30 = vsel %vm60_vm5, %v58_v25, %v87_v27 }
  0x93   :  { %v32_v31 = vpop.permute.xlu0 %31 }
  0x94   :  { %vm33_vm6 = vcmp.eq.s32.totalorder %v28_v23, %v32_v31  ;;  %vm34_vm7 = vcmp.eq.s32.totalorder %v29_v28, %v32_v31 }
  0x95   :  { %v65_v32 = vsel %vm33_vm6, %v63_v29, %v25_v2  ;;  %v66_v33 = vsel %vm34_vm7, %v64_v30, %v26_v3 }
  0x96   :  { %v67_v34 = vmul.f32 64.0, %v65_v32  ;;  %v68_v35 = vmul.f32 64.0, %v66_v33 }
  0x98   :  { %69 = vst [vmem:[#allocation5] sm:$0xff] %v67_v34  ;;  %70 = vst [vmem:[#allocation5 + $0x8] sm:$0xff] %v68_v35 }
  0x99   :  { %129 = shalt.err (!%p126_p12)
}
  0x9a   :  { %s130_s26 = scalar_lea.hbm %s191_s2, 256 }
  0x9b   :  { %p131_p13 = scmp.ne.s32.totalorder %s191_s2, %s130_s26  ;;  %p134_p0 = scmp.lt.u32.totalorder %s130_s26, %s191_s2 }
  0x9d   :  { %p136_p1 = pnand %p134_p0, %p131_p13 }
  0x9f   :  { %139 = shalt.err (!%p136_p1)
}
  0xa0   :  { %80 = dma.vmem_to_hbm [thread:$0]  %s78_s1, 256, %s191_s2, [#allocation4]  }
  0xa1   :  { %142 = dma.done.wait [#allocation4], 256  }
  0xa2   :  { %143 = vsyncadd [#allocation4], 4294967040 }
  0xa3   :  { %84 = vsyncpa [#allocation3], 1 }
  0xa4   :  { %85 = vsyncpa [#allocation4], 1 }

</bundles_post_ra>
